<compile_context>
chip_gen: v7x
topology: tpu7x:2x2x1
jax: 0.10.0
libtpu: 0.0.40
codegen_flags: <defaults>
</compile_context>

<pallas_src>
import jax
import jax.numpy as jnp
from jax.experimental import pallas as pl
from jax.experimental.pallas import tpu as pltpu

_INV_SQRT2 = 0.7071067811865475


def _erf_approx(x):
    """A&S 7.1.26 erf (max abs error ~1.5e-7 before approx-reciprocal), f32 in/out.

    VALU-lean: the divide goes through the EUP reciprocal and the final sign
    restore is a sign-bit copy (no select/negate).
    """
    p = 0.3275911
    a1, a2, a3, a4, a5 = 0.254829592, -0.284496736, 1.421413741, -1.453152027, 1.061405429
    ax = jnp.abs(x)
    t = pl.reciprocal(1.0 + p * ax, approx=True)          # EUP slot, ~2^-12 accurate
    poly = t * (a1 + t * (a2 + t * (a3 + t * (a4 + t * a5))))
    y = 1.0 - poly * jnp.exp(-ax * ax)                     # y = erf(|x|) >= 0
    # erf is odd: copy the sign bit of x onto y (cheaper than jnp.where on v5e).
    sign_bits = pltpu.bitcast(x, jnp.uint32) & jnp.uint32(0x80000000)
    return pltpu.bitcast(pltpu.bitcast(y, jnp.uint32) | sign_bits, jnp.float32)


def _gelu_exact(x):
    # 0.5 * x * (1 + erf(x / sqrt(2)))  (PyTorch F.gelu default, exact formulation)
    return 0.5 * x * (1.0 + _erf_approx(x * _INV_SQRT2))


# ----------------------------- fused MLPBlock kernel --------------------------------

def mlp_kernel(x_ref, w1_ref, b1_ref, w2_ref, b2_ref, o_ref):
    # x_ref: (TM, C) in input dtype; w1_ref: (C, H) bf16; b1_ref: (1, H) f32;
    # w2_ref: (H, C) bf16; b2_ref: (1, C) f32; o_ref: (TM, C) in input dtype.
    x = x_ref[...].astype(jnp.bfloat16)
    h = jnp.dot(x, w1_ref[...], preferred_element_type=jnp.float32) + b1_ref[...]
    h = _gelu_exact(h)                                     # f32
    y = jnp.dot(h.astype(jnp.bfloat16), w2_ref[...],
                preferred_element_type=jnp.float32) + b2_ref[...]
    o_ref[...] = y.astype(o_ref.dtype)


def _pick_tile_m(m, requested):
    """Row-tile size: <= m, multiple of 8, and >= 2 grid steps whenever m allows."""
    t = max(1, min(requested, m))
    if m >= 16 and m // t < 2:          # give v7x's 2nd TensorCore something to do
        t = pl.cdiv(m, 2)
    t = ((t + 7) // 8) * 8              # sublane multiple
    return max(t, 8)


def _const_spec(block_shape):
    """BlockSpec for operands whose block index never changes (single-buffered)."""
    try:
        return pl.BlockSpec(block_shape, lambda i: (0, 0), pipeline_mode=pl.Buffered(1))
    except Exception:  # older jax without pipeline_mode: fall back to default buffering
        return pl.BlockSpec(block_shape, lambda i: (0, 0))


def mlp_block(x, w1, b1, w2, b2, *, tile_m=512):
    """MLPBlock forward: gelu(x @ w1 + b1) @ w2 + b2, applied to the last dim of x.

    w1: (C_in, hidden), w2: (hidden, C_in) -- i.e. nn.Linear.weight.T for fc1/fc2.
    Output dtype matches x.dtype (like the PyTorch module).
    """
    orig_shape = x.shape
    orig_dtype = x.dtype
    c_in = orig_shape[-1]
    hidden = w1.shape[1]

    # Interface contract: weights must already be (in, out), i.e. nn.Linear.weight.T.
    assert w1.shape == (c_in, hidden), f"w1 must be (C_in, hidden), got {w1.shape}"
    assert w2.shape == (hidden, c_in), f"w2 must be (hidden, C_in), got {w2.shape}"
    assert b1.reshape(-1).shape == (hidden,), f"b1 must have {hidden} elements"
    assert b2.reshape(-1).shape == (c_in,), f"b2 must have {c_in} elements"

    # Fold all leading dims (batch, sequence, ...) into the matmul M dimension.
    xf = x.reshape(-1, c_in)
    m = xf.shape[0]

    tile = _pick_tile_m(m, tile_m)
    grid_m = pl.cdiv(m, tile)           # ragged last block handled by Pallas (no pad/slice)

    # bf16 weights for the MXU (cast once, here); f32 biases for the f32 epilogue.
    w1b = w1.astype(jnp.bfloat16)
    w2b = w2.astype(jnp.bfloat16)
    b1f = b1.astype(jnp.float32).reshape(1, hidden)
    b2f = b2.astype(jnp.float32).reshape(1, c_in)

    x_bytes = xf.dtype.itemsize
    o_bytes = jnp.dtype(orig_dtype).itemsize

    # VMEM footprint: double-buffered x/out tiles, single-buffered bf16 weights,
    # f32 biases (sublane-padded) and the f32 hidden intermediate.  Set the limit
    # with headroom, clamped to 16-32 MiB (never the full 64 MiB of v7x VMEM).
    footprint = (2 * tile * c_in * x_bytes
                 + 2 * tile * c_in * o_bytes
                 + (c_in * hidden + hidden * c_in) * 2
                 + (hidden + c_in) * 4 * 8
                 + 2 * tile * hidden * 4)
    vmem_limit = int(min(max(2 * footprint, 16 * 1024 * 1024), 32 * 1024 * 1024))

    cost = pl.CostEstimate(
        flops=4 * m * c_in * hidden,                      # two matmuls
        transcendentals=2 * m * hidden,                   # exp + approx reciprocal
        bytes_accessed=(m * c_in * (x_bytes + o_bytes)
                        + 2 * c_in * hidden * 2
                        + (hidden + c_in) * 4),
    )

    out = pl.pallas_call(
        mlp_kernel,
        out_shape=jax.ShapeDtypeStruct((m, c_in), orig_dtype),
        grid=(grid_m,),
        in_specs=[
            pl.BlockSpec((tile, c_in), lambda i: (i, 0)),
            _const_spec((c_in, hidden)),
            _const_spec((1, hidden)),
            _const_spec((hidden, c_in)),
            _const_spec((1, c_in)),
        ],
        out_specs=pl.BlockSpec((tile, c_in), lambda i: (i, 0)),
        compiler_params=pltpu.CompilerParams(
            dimension_semantics=("parallel",),            # row-tile axis is independent
            vmem_limit_bytes=vmem_limit,
        ),
        cost_estimate=cost,
    )(xf, w1b, b1f, w2b, b2f)

    return out.reshape(orig_shape)


# ----------------------------- pure-JAX reference ------------------------------------

def mlp_ref(x, w1, b1, w2, b2):
    h = x @ w1 + b1
    h = jax.nn.gelu(h, approximate=False)   # exact erf GELU, same as PyTorch default
    return h @ w2 + b2


# ----------------------------- main ---------------------------------------------------

if __name__ == "__main__":
    key = jax.random.PRNGKey(0)
    kx, k1, k2, k3, k4 = jax.random.split(key, 5)

    # Small, lane-dense shapes: (B, L, C_in) with C_in=128, hidden=256 -> M = B*L = 128.
    # _pick_tile_m shrinks tile_m to 64 here so the grid has 2 steps (v7x megacore).
    B, L, C_IN, HIDDEN = 2, 64, 128, 256

    x = jax.random.normal(kx, (B, L, C_IN), dtype=jnp.float32)
    w1 = (0.05 * jax.random.normal(k1, (C_IN, HIDDEN))).astype(jnp.float32)   # fc1.weight.T
    b1 = (0.02 * jax.random.normal(k2, (HIDDEN,))).astype(jnp.float32)        # fc1.bias
    w2 = (0.05 * jax.random.normal(k3, (HIDDEN, C_IN))).astype(jnp.float32)   # fc2.weight.T
    b2 = (0.02 * jax.random.normal(k4, (C_IN,))).astype(jnp.float32)          # fc2.bias

    out = mlp_block(x, w1, b1, w2, b2)
    out = jax.block_until_ready(out)

    ref = mlp_ref(x, w1, b1, w2, b2)

    assert out.shape == (B, L, C_IN)
    assert out.dtype == x.dtype
    assert bool(jnp.all(jnp.isfinite(out)))
    # bf16 MXU feed (f32 accumulate) + approx erf: stay within a bf16-appropriate tolerance.
    assert bool(jnp.allclose(out, ref, rtol=2e-2, atol=2e-2))
    print("KERNEL_OK")
</pallas_src>

<mosaic_0001>
module attributes {stable_mosaic.version = 11 : i64} {
  func.func @mlp_kernel(%arg0: i32, %arg1: memref<64x128xf32, #tpu.memory_space<vmem>>, %arg2: memref<128x256xbf16, #tpu.memory_space<vmem>>, %arg3: memref<1x256xf32, #tpu.memory_space<vmem>>, %arg4: memref<256x128xbf16, #tpu.memory_space<vmem>>, %arg5: memref<1x128xf32, #tpu.memory_space<vmem>>, %arg6: memref<64x128xf32, #tpu.memory_space<vmem>>) attributes {dimension_semantics = [#tpu.dimension_semantics<parallel>], iteration_bounds = array<i64: 2>, scalar_prefetch = 0 : i64, scratch_operands = 0 : i64, tpu.core_type = #tpu.core_type<tc>, window_params = [{transform_indices = @transform_0, window_bounds = array<i64: 64, 128>}, {pipeline_mode = #tpu.pipeline_mode<synchronous>, transform_indices = @transform_1, window_bounds = array<i64: 128, 256>}, {pipeline_mode = #tpu.pipeline_mode<synchronous>, transform_indices = @transform_2, window_bounds = array<i64: 1, 256>}, {pipeline_mode = #tpu.pipeline_mode<synchronous>, transform_indices = @transform_3, window_bounds = array<i64: 256, 128>}, {pipeline_mode = #tpu.pipeline_mode<synchronous>, transform_indices = @transform_4, window_bounds = array<i64: 1, 128>}, {transform_indices = @transform_5, window_bounds = array<i64: 64, 128>}]} {
    %c0 = arith.constant 0 : index
    %c0_0 = arith.constant 0 : index
    %0 = vector.load %arg1[%c0, %c0_0] : memref<64x128xf32, #tpu.memory_space<vmem>>, vector<64x128xf32>
    %1 = arith.truncf %0 : vector<64x128xf32> to vector<64x128xbf16>
    %c0_1 = arith.constant 0 : index
    %c0_2 = arith.constant 0 : index
    %2 = vector.load %arg2[%c0_1, %c0_2] : memref<128x256xbf16, #tpu.memory_space<vmem>>, vector<128x256xbf16>
    %cst = arith.constant dense<0.000000e+00> : vector<64x256xf32>
    %3 = tpu.matmul %1, %2, %cst {dimension_numbers = #tpu.dot_dimension_numbers<[1], [0], [0], [1], [0, 0, 1, 1], [], []>} : vector<64x128xbf16>, vector<128x256xbf16>, vector<64x256xf32> -> vector<64x256xf32>
    %c0_3 = arith.constant 0 : index
    %c0_4 = arith.constant 0 : index
    %4 = vector.load %arg3[%c0_3, %c0_4] : memref<1x256xf32, #tpu.memory_space<vmem>>, vector<1x256xf32>
    %5 = vector.broadcast %4 : vector<1x256xf32> to vector<64x256xf32>
    %6 = arith.addf %3, %5 : vector<64x256xf32>
    %cst_5 = arith.constant 5.000000e-01 : f32
    %7 = vector.broadcast %cst_5 : f32 to vector<64x256xf32>
    %8 = arith.mulf %7, %6 : vector<64x256xf32>
    %cst_6 = arith.constant 0.707106769 : f32
    %9 = vector.broadcast %cst_6 : f32 to vector<64x256xf32>
    %10 = arith.mulf %6, %9 : vector<64x256xf32>
    %11 = math.absf %10 : vector<64x256xf32>
    %cst_7 = arith.constant 0.327591091 : f32
    %12 = vector.broadcast %cst_7 : f32 to vector<64x256xf32>
    %13 = arith.mulf %12, %11 : vector<64x256xf32>
    %cst_8 = arith.constant 1.000000e+00 : f32
    %14 = vector.broadcast %cst_8 : f32 to vector<64x256xf32>
    %15 = arith.addf %14, %13 : vector<64x256xf32>
    %16 = tpu.reciprocal %15 {approx = true} : vector<64x256xf32> -> vector<64x256xf32>
    %cst_9 = arith.constant 1.06140542 : f32
    %17 = vector.broadcast %cst_9 : f32 to vector<64x256xf32>
    %18 = arith.mulf %16, %17 : vector<64x256xf32>
    %cst_10 = arith.constant -1.45315206 : f32
    %19 = vector.broadcast %cst_10 : f32 to vector<64x256xf32>
    %20 = arith.addf %19, %18 : vector<64x256xf32>
    %21 = arith.mulf %16, %20 : vector<64x256xf32>
    %cst_11 = arith.constant 1.42141378 : f32
    %22 = vector.broadcast %cst_11 : f32 to vector<64x256xf32>
    %23 = arith.addf %22, %21 : vector<64x256xf32>
    %24 = arith.mulf %16, %23 : vector<64x256xf32>
    %cst_12 = arith.constant -0.284496725 : f32
    %25 = vector.broadcast %cst_12 : f32 to vector<64x256xf32>
    %26 = arith.addf %25, %24 : vector<64x256xf32>
    %27 = arith.mulf %16, %26 : vector<64x256xf32>
    %cst_13 = arith.constant 0.254829586 : f32
    %28 = vector.broadcast %cst_13 : f32 to vector<64x256xf32>
    %29 = arith.addf %28, %27 : vector<64x256xf32>
    %30 = arith.mulf %16, %29 : vector<64x256xf32>
    %cst_14 = arith.constant 0.000000e+00 : f32
    %31 = vector.broadcast %cst_14 : f32 to vector<64x256xf32>
    %32 = arith.subf %31, %11 : vector<64x256xf32>
    %33 = arith.mulf %32, %11 : vector<64x256xf32>
    %34 = math.exp %33 : vector<64x256xf32>
    %35 = arith.mulf %30, %34 : vector<64x256xf32>
    %cst_15 = arith.constant 1.000000e+00 : f32
    %36 = vector.broadcast %cst_15 : f32 to vector<64x256xf32>
    %37 = arith.subf %36, %35 : vector<64x256xf32>
    %38 = tpu.bitcast %10 : vector<64x256xf32> -> vector<64x256xi32>
    %c-2147483648_i32 = arith.constant -2147483648 : i32
    %39 = vector.broadcast %c-2147483648_i32 : i32 to vector<64x256xi32>
    %40 = arith.andi %38, %39 : vector<64x256xi32>
    %41 = tpu.bitcast %37 : vector<64x256xf32> -> vector<64x256xi32>
    %42 = arith.ori %41, %40 : vector<64x256xi32>
    %43 = tpu.bitcast %42 : vector<64x256xi32> -> vector<64x256xf32>
    %cst_16 = arith.constant 1.000000e+00 : f32
    %44 = vector.broadcast %cst_16 : f32 to vector<64x256xf32>
    %45 = arith.addf %44, %43 : vector<64x256xf32>
    %46 = arith.mulf %8, %45 : vector<64x256xf32>
    %47 = arith.truncf %46 : vector<64x256xf32> to vector<64x256xbf16>
    %c0_17 = arith.constant 0 : index
    %c0_18 = arith.constant 0 : index
    %48 = vector.load %arg4[%c0_17, %c0_18] : memref<256x128xbf16, #tpu.memory_space<vmem>>, vector<256x128xbf16>
    %cst_19 = arith.constant dense<0.000000e+00> : vector<64x128xf32>
    %49 = tpu.matmul %47, %48, %cst_19 {dimension_numbers = #tpu.dot_dimension_numbers<[1], [0], [0], [1], [0, 0, 1, 1], [], []>} : vector<64x256xbf16>, vector<256x128xbf16>, vector<64x128xf32> -> vector<64x128xf32>
    %c0_20 = arith.constant 0 : index
    %c0_21 = arith.constant 0 : index
    %50 = vector.load %arg5[%c0_20, %c0_21] : memref<1x128xf32, #tpu.memory_space<vmem>>, vector<1x128xf32>
    %51 = vector.broadcast %50 : vector<1x128xf32> to vector<64x128xf32>
    %52 = arith.addf %49, %51 : vector<64x128xf32>
    %c0_22 = arith.constant 0 : index
    %c0_23 = arith.constant 0 : index
    %53 = vector.load %arg6[%c0_22, %c0_23] : memref<64x128xf32, #tpu.memory_space<vmem>>, vector<64x128xf32>
    tpu.vector_store %arg6[%c0_22, %c0_23], %52 {strides = array<i32>} : memref<64x128xf32, #tpu.memory_space<vmem>>, vector<64x128xf32>,
    return
  }
  func.func @transform_0(%arg0: i32) -> (i32, i32) {
    %c0_i32 = arith.constant 0 : i32
    %c0_i32_0 = arith.constant 0 : i32
    return %arg0, %c0_i32 : i32, i32
  }
  func.func @transform_1(%arg0: i32) -> (i32, i32) {
    %c0_i32 = arith.constant 0 : i32
    %c0_i32_0 = arith.constant 0 : i32
    %c0_i32_1 = arith.constant 0 : i32
    return %c0_i32, %c0_i32_0 : i32, i32
  }
  func.func @transform_2(%arg0: i32) -> (i32, i32) {
    %c0_i32 = arith.constant 0 : i32
    %c0_i32_0 = arith.constant 0 : i32
    %c0_i32_1 = arith.constant 0 : i32
    return %c0_i32, %c0_i32_0 : i32, i32
  }
  func.func @transform_3(%arg0: i32) -> (i32, i32) {
    %c0_i32 = arith.constant 0 : i32
    %c0_i32_0 = arith.constant 0 : i32
    %c0_i32_1 = arith.constant 0 : i32
    return %c0_i32, %c0_i32_0 : i32, i32
  }
  func.func @transform_4(%arg0: i32) -> (i32, i32) {
    %c0_i32 = arith.constant 0 : i32
    %c0_i32_0 = arith.constant 0 : i32
    %c0_i32_1 = arith.constant 0 : i32
    return %c0_i32, %c0_i32_0 : i32, i32
  }
  func.func @transform_5(%arg0: i32) -> (i32, i32) {
    %c0_i32 = arith.constant 0 : i32
    %c0_i32_0 = arith.constant 0 : i32
    return %arg0, %c0_i32 : i32, i32
  }
}

</mosaic_0001>

<bundles_post_ra>
// kernel: tpu_custom_call.1
= control target key start
LH: loop header
LB: loop body
LE: loop exit
PB: predicated region body
PF: predicated region fallthrough
CT: control target
= control target key end

     0   :  { %10 = vsyncpa [#allocation3], 0  ;;  %s2347_s0 = inlined_call_operand.hbm [shape: f32[128,128], index: 0, kind: input, shape index: {}]   ;;  %s2348_s1 = inlined_call_operand.hbm [shape: bf16[128,256], index: 1, kind: input, shape index: {}]   ;;  %s2349_s2 = inlined_call_operand.vmem [shape: f32[1,256], index: 2, kind: input, shape index: {}]   ;;  %s2350_s3 = inlined_call_operand.hbm [shape: bf16[256,128], index: 3, kind: input, shape index: {}]   ;;  %s2351_s4 = inlined_call_operand.vmem [shape: f32[1,128], index: 4, kind: input, shape index: {}]   ;;  %s2352_s5 = inlined_call_operand.hbm [shape: f32[128,128], index: 5, kind: output, shape index: {}]  }
   0x1   :  { %12 = vsyncpa [#allocation3 + $0x1], 0 }
   0x2   :  { %13 = vsyncpa [#allocation6], 0 }
   0x3   :  { %14 = vsyncpa [#allocation4], 0 }
   0x4   :  { %16 = vsyncpa [#allocation4 + $0x1], 0  ;;  %s1708_s18 = smov 0   ;;  %s1710_s19 = smov 0  }
   0x5   :  { %s1712_s20 = smov 0   ;;  %s1714_s21 = smov 0  }
   0x6 LB: > { %s1729_s22 = sadd.s32 4294967295, %s1665_s21   ;;  %s1238_s23 = sadd.s32 4294967294, %s1665_s21   ;;  %s1665_s21 = sphi %s1714_s21, %s2391_s21   ;;  %s1661_s20 = sphi %s1712_s20, %s2390_s20   ;;  %s1657_s19 = sphi %s1710_s19, %s2389_s19   ;;  %s1653_s18 = sphi %s1708_s18, %s2388_s18  }
   0x7   : > { %p42_p0 = scmp.ne.s32.totalorder %s1657_s19, %s1653_s18  ;;  %p2353_p1 = scmp.eq.s32.totalorder %s1729_s22, 0 }
   0x8   : > { %p156_p3 = scmp.eq.s32.totalorder %s1238_s23, 1  ;;  %p1239_p5 = scmp.ge.s32.totalorder %s1665_s21, 1 }
   0x9   : > { %p1738_p4 = por %p2353_p1, %p42_p0  ;;  %p163_p7 = scmp.lt.s32.totalorder %s1665_s21, 3 }
   0xa   : > { %p1743_p6 = por %p156_p3, %p42_p0  ;;  %s1667_s27 = smov [#allocation5]  }
   0xb   : > { %s2359_s24 = scalar_select %p1738_p4, 1, 0 }
   0xc   : > { %s2360_s25 = scalar_select %p1743_p6, 1, 0 }
   0xd   : > { %p1748_p8 = pnand %p1239_p5, %p163_p7  ;;  %s175_s28 = sshll.u32 %s1667_s27, 4  ;;  %s1752_s28 = int_to_ptr.vmem [resolvable:$true] %s175_s28 }
   0xe   : > { %s1668_s30 = smov [#allocation7]   ;;  %s1509_s9 = scalar_lea.hbm %s2348_s1, 2048 }
   0xf   : > { %p1343_p9 = pneg %p1748_p8  ;;  %s191_s6 = sshll.u32 %s1668_s30, 4  ;;  %s1763_s6 = int_to_ptr.vmem [resolvable:$true] %s191_s6 }
  0x10   : > { %p1510_p12 = scmp.ne.s32.totalorder %s2348_s1, %s1509_s9  ;;  %p1516_p5 = scmp.lt.u32.totalorder %s1509_s9, %s2348_s1 }
  0x11   : > { %p1759_p11 = pnand %p1343_p9, %p2353_p1 }
  0x13   : > { %p1511_p13 = pneg %p1759_p11 }
  0x15   : > { %p1512_p0 = pnand %p1511_p13, %p1510_p12 }
  0x17   : > { %p1513_p3 = pneg %p1512_p0 }
  0x19   : > { %p1518_p7 = pnand %p1516_p5, %p1513_p3 }
  0x1b   : > { %1521 = shalt.err (!%p1518_p7)
}
  0x1c   : > { %s1522_s14 = scalar_lea.vmem %s1752_s28, 2048  ;;  %p1530_p2 = scmp.lt.s32.totalorder %s1752_s28, %s1752_s28 }
  0x1d   : > { %p1523_p9 = scmp.ne.s32.totalorder %s1752_s28, %s1522_s14  ;;  %p1531_p12 = scmp.lt.s32.totalorder %s1522_s14, %s1522_s14 }
  0x1f   : > { %p1525_p10 = pnand %p1523_p9, %p1511_p13  ;;  %p1532_p0 = por %p1531_p12, %p1530_p2 }
  0x21   : > { %p1526_p1 = pneg %p1525_p10 }
  0x23   : > { %p1533_p6 = pnand %p1532_p0, %p1526_p1 }
  0x25   : > { %1536 = shalt.err (!%p1533_p6)
}
  0x26   : > { %s1669_s15 = smov 128   ;;  %s1670_s16 = smov 8  }
  0x27   : > { %1346 = dma.hbm_to_vmem [thread:$0]  (!%p1759_p11), %s2348_s1, 2048, %s1752_s28, [#allocation6], %s1669_s15, %s1669_s15, %s1670_s16  }
  0x28   : > { %s1537_s7 = scalar_lea.hbm %s2350_s3, 2048 }
  0x29   : > { %p1538_p1 = scmp.ne.s32.totalorder %s2350_s3, %s1537_s7  ;;  %p1544_p10 = scmp.lt.u32.totalorder %s1537_s7, %s2350_s3 }
  0x2b   : > { %p1540_p2 = pnand %p1538_p1, %p1511_p13 }
  0x2d   : > { %p1541_p6 = pneg %p1540_p2 }
  0x2f   : > { %p1546_p3 = pnand %p1544_p10, %p1541_p6 }
  0x31   : > { %1549 = shalt.err (!%p1546_p3)
}
  0x32   : > { %s1550_s28 = scalar_lea.vmem %s1763_s6, 2048  ;;  %p1558_p12 = scmp.lt.s32.totalorder %s1763_s6, %s1763_s6 }
  0x33   : > { %p1551_p5 = scmp.ne.s32.totalorder %s1763_s6, %s1550_s28  ;;  %p1559_p0 = scmp.lt.s32.totalorder %s1550_s28, %s1550_s28 }
  0x35   : > { %p1553_p7 = pnand %p1551_p5, %p1511_p13  ;;  %p1560_p1 = por %p1559_p0, %p1558_p12 }
  0x37   : > { %p1554_p9 = pneg %p1553_p7 }
  0x39   : > { %p1561_p2 = pnand %p1560_p1, %p1554_p9 }
  0x3b   : > { %1564 = shalt.err (!%p1561_p2)
}
  0x3c   : > { %s1671_s12 = smov 64   ;;  %s1672_s13 = smov 4  }
  0x3d   : > { %1349 = dma.hbm_to_vmem [thread:$0]  (!%p1759_p11), %s2350_s3, 2048, %s1763_s6, [#allocation6], %s1671_s12, %s1671_s12, %s1672_s13  }
  0x3e   : > { %s1821_s23 = sadd.s32 1, %s1665_s21   ;;  %s29_s30 = sadd.s32 1, %s1661_s20 }
  0x3f   : > { %s26_s27 = ssub.s32 %s1665_s21, %s1821_s23  ;;  %p36_p6 = scmp.ne.s32.totalorder %s1661_s20, %s1657_s19 }
  0x40   : > { %p27_p13 = scmp.eq.s32.totalorder %s26_s27, 0  ;;  %p37_p10 = scmp.eq.s32.totalorder %s1665_s21, 0 }
  0x41   : > { %p2363_p5 = scmp.eq.s32.totalorder %s1729_s22, 1  ;;  %p1360_p9 = scmp.lt.s32.totalorder %s1665_s21, 2 }
  0x42   : > { %s1830_s7 = scalar_select %p27_p13, %s1661_s20, %s29_s30  }
  0x43   : > { %p38_p3 = por %p37_p10, %p36_p6  ;;  %p1834_p7 = por %p2363_p5, %p36_p6 }
  0x44   : > { %s208_s29 = sand.u32 1, %s1661_s20   ;;  %s1289_s6 = sshll.u32 %s1665_s21, 10 }
  0x45   : > { %s2364_s8 = scalar_select %p1834_p7, 1, 0 }
  0x46   : > { %s1243_s9 = sshll.u32 %s208_s29, 6  ;;  %s1844_s28 = scalar_lea.hbm %s2347_s0, %s1289_s6 }
  0x47   : > { %s212_s12 = scalar_lea.vmem [#allocation2], %s1243_s9  ;;  %p1848_p11 = pnand %p1360_p9, %p38_p3 }
  0x48   : > { %s219_s13 = sshll.u32 %s212_s12, 4  ;;  %s1852_s17 = scalar_lea.sflag [#allocation3], %s208_s29  ;;  %s1846_s13 = int_to_ptr.vmem [resolvable:$true] %s219_s13 }
  0x49   : > { %s1565_s27 = scalar_lea.hbm %s1844_s28, 1024  ;;  %p1567_p0 = pneg %p1848_p11 }
  0x4a   : > { %p1566_p12 = scmp.ne.s32.totalorder %s1844_s28, %s1565_s27  ;;  %s1570_s6 = scalar_lea.hbm %s2347_s0, 2048 }
  0x4b   : > { %p1571_p13 = scmp.lt.u32.totalorder %s1844_s28, %s2347_s0  ;;  %p1572_p6 = scmp.lt.u32.totalorder %s1570_s6, %s1565_s27 }
  0x4c   : > { %p1568_p1 = pnand %p1567_p0, %p1566_p12  ;;  %p1574_p3 = scmp.lt.u32.totalorder %s1565_s27, %s1844_s28 }
  0x4d   : > { %p1573_p10 = por %p1572_p6, %p1571_p13 }
  0x4e   : > { %p1569_p2 = pneg %p1568_p1 }
  0x4f   : > { %p1575_p5 = por %p1574_p3, %p1573_p10 }
  0x51   : > { %p1576_p9 = pnand %p1575_p5, %p1569_p2 }
  0x53   : > { %1579 = shalt.err (!%p1576_p9)
}
  0x54   : > { %s1580_s29 = scalar_lea.vmem %s1846_s13, 1024  ;;  %s1673_s12 = smov [#allocation2]  }
  0x55   : > { %p1581_p12 = scmp.ne.s32.totalorder %s1846_s13, %s1580_s29  ;;  %s1585_s30 = sshll.u32 %s1673_s12, 4  ;;  %s1586_s30 = int_to_ptr.vmem [resolvable:$false] %s1585_s30 }
  0x56   : > { %s1587_s9 = scalar_lea.vmem %s1586_s30, 2048  ;;  %p1588_p4 = scmp.lt.s32.totalorder %s1846_s13, %s1586_s30 }
  0x57   : > { %p1583_p1 = pnand %p1581_p12, %p1567_p0  ;;  %p1589_p13 = scmp.lt.s32.totalorder %s1587_s9, %s1580_s29 }
  0x59   : > { %p1584_p7 = pneg %p1583_p1  ;;  %p1590_p6 = por %p1589_p13, %p1588_p4 }
  0x5b   : > { %p1591_p10 = pnand %p1590_p6, %p1584_p7 }
  0x5d   : > { %1594 = shalt.err (!%p1591_p10)
}
  0x5e   : > { %1353 = dma.hbm_to_vmem [thread:$0]  (!%p1848_p11), %s1844_s28, 1024, %s1846_s13, %s1852_s17, %s1669_s15, %s1669_s15, %s1670_s16  }
  0x5f   : > { %231 = sbr.rel (%p1748_p8) target bundleno = 720 (0x2d0), region = 40 }
  0x66   : > { %s1886_s27 = sand.u32 1, %s1657_s19   ;;  %p2366_p4 = scmp.ne.s32.totalorder %s2359_s24, 0 }
  0x67   : > { %s1247_s6 = sshll.u32 %s1886_s27, 6  ;;  %s234_s10 = scalar_lea.sflag [#allocation3], %s1886_s27 }
  0x68   : > { %s1892_s14 = scalar_lea.vmem [#allocation2], %s1247_s6 }
  0x69   : > { %1640 = dma.done.wait (%p2366_p4), %s234_s10, 1024  }
  0x6a   : > { %1642 = vsyncadd (%p2366_p4), %s234_s10, 4294966272  ;;  %p2367_p7 = scmp.eq.s32.totalorder %s1729_s22, 0 }
  0x6c   : > { %1644 = dma.done.wait (%p2367_p7), [#allocation6], 4096   ;;  %p2368_p8 = pmov %p2367_p7 }
  0x6d   : > { %v1674_v0 = vmov 0   ;;  %v1405_v1 = vld [vmem:[#allocation5 + $0x4] ss:$8 sps:$4 sm:$0xff]   ;;  %v1407_v2 = vld [vmem:[#allocation5] ss:$8 sps:$4 sm:$0xff]   ;;  %v277_v20 = vld [vmem:[%s1892_s14 + $0x10] sm:$0xff]  ;;  %v305_v45 = vlaneseq }
  0x6e   : > { %1646 = vsyncadd (%p2368_p8), [#allocation6], 4294963200  ;;  %427 = vmatprep.mubr.bf16.mxu0 %v1674_v0  ;;  %395 = vmatprep.subr.bf16.mxu0 %v1405_v1  ;;  %v1408_v3 = vld [vmem:[#allocation5 + $0x14] ss:$8 sps:$4 sm:$0xff]   ;;  %v1410_v4 = vld [vmem:[#allocation5 + $0x10] ss:$8 sps:$4 sm:$0xff]  }
  0x6f   : > { %396 = vmatpush1.bf16.msra.mxu0 %v1407_v2  ;;  %v1411_v5 = vld [vmem:[#allocation5 + $0x24] ss:$8 sps:$4 sm:$0xff]   ;;  %v1413_v6 = vld [vmem:[#allocation5 + $0x20] ss:$8 sps:$4 sm:$0xff]   ;;  %v1414_v7 = vld [vmem:[#allocation5 + $0x34] ss:$8 sps:$4 sm:$0xff]  }
  0x70   : > { %397 = vmatprep.subr.bf16.mxu0 %v1408_v3  ;;  %v1416_v8 = vld [vmem:[#allocation5 + $0x30] ss:$8 sps:$4 sm:$0xff]   ;;  %v1417_v9 = vld [vmem:[#allocation5 + $0x44] ss:$8 sps:$4 sm:$0xff]   ;;  %v1419_v10 = vld [vmem:[#allocation5 + $0x40] ss:$8 sps:$4 sm:$0xff]  }
  0x71   : > { %v1420_v11 = vld [vmem:[#allocation5 + $0x54] ss:$8 sps:$4 sm:$0xff]   ;;  %v1422_v12 = vld [vmem:[#allocation5 + $0x50] ss:$8 sps:$4 sm:$0xff]   ;;  %v1423_v13 = vld [vmem:[#allocation5 + $0x64] ss:$8 sps:$4 sm:$0xff]  }
  0x72   : > { %v1425_v14 = vld [vmem:[#allocation5 + $0x60] ss:$8 sps:$4 sm:$0xff]   ;;  %v1426_v15 = vld [vmem:[#allocation5 + $0x74] ss:$8 sps:$4 sm:$0xff]   ;;  %v1428_v16 = vld [vmem:[#allocation5 + $0x70] ss:$8 sps:$4 sm:$0xff]  }
  0x73   : > { %398 = vmatpush1.bf16.msra.mxu0 %v1410_v4  ;;  %v275_v17 = vld [vmem:[%s1892_s14] sm:$0xff]  ;;  %v276_v18 = vld [vmem:[%s1892_s14 + $0x8] sm:$0xff]  ;;  %v278_v21 = vld [vmem:[%s1892_s14 + $0x18] sm:$0xff]  ;;  %v306_v46 = vshrl.u32 %v305_v45, 7  ;;  %s2286_s28 = scalar_lea.vmem [#allocation8], %s1247_s6  ;;  %s1290_s17 = sshll.u32 %s1729_s22, 10 }
  0x74   : > { %399 = vmatprep.subr.bf16.mxu0 %v1411_v5  ;;  %v283_v19 = vpack.c.bf16 %v276_v18, %v275_v17  ;;  %v284_v22 = vpack.c.bf16 %v278_v21, %v277_v20  ;;  %v279_v23 = vld [vmem:[%s1892_s14 + $0x20] sm:$0xff]  ;;  %v280_v24 = vld [vmem:[%s1892_s14 + $0x28] sm:$0xff]  ;;  %v281_v26 = vld [vmem:[%s1892_s14 + $0x30] sm:$0xff]  ;;  %s1146_s13 = sshll.u32 %s2286_s28, 4  ;;  %s2301_s12 = scalar_lea.hbm %s2352_s5, %s1290_s17  ;;  %s2296_s13 = int_to_ptr.vmem [resolvable:$true] %s1146_s13 }
  0x75   : > { %v285_v25 = vpack.c.bf16 %v280_v24, %v279_v23  ;;  %v282_v27 = vld [vmem:[%s1892_s14 + $0x38] sm:$0xff]  ;;  %v1429_v29 = vld [vmem:[#allocation7 + $0x40] sm:$0xff]   ;;  %v1431_v31 = vld [vmem:[#allocation7 + $0x48] sm:$0xff]   ;;  %v307_v47 = vsub.s32 0, %v306_v46  ;;  %v311_v49 = vsub.s32 1, %v306_v46  ;;  %s1133_s30 = scalar_lea.sflag [#allocation4], %s1886_s27 }
  0x76   : > { %v286_v28 = vpack.c.bf16 %v282_v27, %v281_v26  ;;  %v1430_v30 = vld [vmem:[#allocation7] sm:$0xff]   ;;  %1291 = vmatprep.subr.bf16.mxu1 %v1429_v29  ;;  %v1432_v32 = vld [vmem:[#allocation7 + $0x8] sm:$0xff]   ;;  %v1433_v33 = vld [vmem:[#allocation7 + $0x50] sm:$0xff]   ;;  %s1595_s9 = scalar_lea.vmem %s2296_s13, 1024  ;;  %p2385_p0 = scmp.ne.s32.totalorder %s2364_s8, 0 }
  0x77   : > { %400 = vmatpush1.bf16.msra.mxu0 %v1413_v6  ;;  %1292 = vmatpush3.bf16.msra.mxu1 %v1430_v30  ;;  %v1434_v34 = vld [vmem:[#allocation7 + $0x10] sm:$0xff]   ;;  %v1435_v35 = vld [vmem:[#allocation7 + $0x58] sm:$0xff]   ;;  %v1437_v37 = vld [vmem:[#allocation7 + $0x60] sm:$0xff]   ;;  %p1596_p11 = scmp.ne.s32.totalorder %s2296_s13, %s1595_s9  ;;  %s1675_s22 = smov [#allocation8]  }
  0x78   : > { %401 = vmatprep.subr.bf16.mxu0 %v1414_v7  ;;  %1293 = vmatprep.subr.bf16.mxu1 %v1431_v31  ;;  %v1436_v36 = vld [vmem:[#allocation7 + $0x18] sm:$0xff]   ;;  %v1438_v38 = vld [vmem:[#allocation7 + $0x20] sm:$0xff]   ;;  %v1439_v39 = vld [vmem:[#allocation7 + $0x68] sm:$0xff]   ;;  %s1599_s6 = sshll.u32 %s1675_s22, 4  ;;  %s1600_s6 = int_to_ptr.vmem [resolvable:$false] %s1599_s6 }
  0x79   : > { %v1440_v40 = vld [vmem:[#allocation7 + $0x28] sm:$0xff]   ;;  %v1441_v41 = vld [vmem:[#allocation7 + $0x70] sm:$0xff]   ;;  %v1443_v43 = vld [vmem:[#allocation7 + $0x78] sm:$0xff]   ;;  %p1597_p2 = pnand %p1596_p11, %p2385_p0  ;;  %s1601_s10 = scalar_lea.vmem %s1600_s6, 2048 }
  0x7a   : > { %v1442_v42 = vld [vmem:[#allocation7 + $0x30] sm:$0xff]   ;;  %v1444_v44 = vld [vmem:[#allocation7 + $0x38] sm:$0xff]   ;;  %v303_v48 = vld [vmem:[%s2349_s2] sm:$0x3]  ;;  %p1602_p5 = scmp.lt.s32.totalorder %s2296_s13, %s1600_s6  ;;  %p1603_p9 = scmp.lt.s32.totalorder %s1601_s10, %s1595_s9 }
  0x7b   : > { %402 = vmatpush1.bf16.msra.mxu0 %v1416_v8  ;;  %1294 = vmatpush3.bf16.msra.mxu1 %v1432_v32  ;;  %v1913_v50 = vrot.slane %v303_v48, %v307_v47  ;;  %v1915_v51 = vrot.slane %v303_v48, %v311_v49  ;;  %p1598_p3 = pneg %p1597_p2 }
  0x7c   : > { %403 = vmatprep.subr.bf16.mxu0 %v1417_v9  ;;  %1295 = vmatprep.subr.bf16.mxu1 %v1433_v33  ;;  %p1604_p12 = por %p1603_p9, %p1602_p5 }
  0x7e   : > { %p1605_p1 = pnand %p1604_p12, %p1598_p3 }
  0x7f   : > { %404 = vmatpush1.bf16.msra.mxu0 %v1419_v10  ;;  %1296 = vmatpush3.bf16.msra.mxu1 %v1434_v34 }
  0x80   : > { %405 = vmatprep.subr.bf16.mxu0 %v1420_v11  ;;  %1297 = vmatprep.subr.bf16.mxu1 %v1435_v35 }
  0x83   : > { %406 = vmatpush1.bf16.msra.mxu0 %v1422_v12  ;;  %1298 = vmatpush3.bf16.msra.mxu1 %v1436_v36 }
  0x84   : > { %407 = vmatprep.subr.bf16.mxu0 %v1423_v13  ;;  %1299 = vmatprep.subr.bf16.mxu1 %v1437_v37 }
  0x87   : > { %408 = vmatpush1.bf16.msra.mxu0 %v1425_v14  ;;  %1300 = vmatpush3.bf16.msra.mxu1 %v1438_v38 }
  0x88   : > { %409 = vmatprep.subr.bf16.mxu0 %v1426_v15  ;;  %1301 = vmatprep.subr.bf16.mxu1 %v1439_v39 }
  0x8b   : > { %410 = vmatpush1.bf16.msra.mxu0 %v1428_v16  ;;  %1302 = vmatpush3.bf16.msra.mxu1 %v1440_v40 }
  0x8c   : > { %1303 = vmatprep.subr.bf16.mxu1 %v1441_v41 }
  0x8e   : > { %428 = vmatmul.mubr.bf16.vlgmr.msra.gmra.mrb[0].mxu0 %v283_v19 }
  0x8f   : > { %437 = vmatprep.mubr.bf16.mxu0 %v1674_v0  ;;  %1304 = vmatpush3.bf16.msra.mxu1 %v1442_v42 }
  0x90   : > { %1305 = vmatprep.subr.bf16.mxu1 %v1443_v43 }
  0x93   : > { %1306 = vmatpush3.bf16.msra.mxu1 %v1444_v44 }
  0x96   : > { %438 = vmatmul.mubr.bf16.gmra.mrb[4].mxu0 %v284_v22 }
  0x97   : > { %447 = vmatprep.mubr.bf16.mxu0 %v1674_v0 }
  0x9e   : > { %448 = vmatmul.mubr.bf16.gmra.mrb[8].mxu0 %v285_v25 }
  0x9f   : > { %457 = vmatprep.mubr.bf16.mxu0 %v1674_v0 }
  0xa6   : > { %458 = vmatmul.mubr.bf16.gmra.mrb[12].mxu0 %v286_v28 }
 0x161   : > { %v429_v52 = vpop.f32.mrb[0].mxu0 }
 0x162   : > { %v430_v53 = vadd.f32 %v429_v52, %v1913_v50  ;;  %v431_v54 = vpop.f32.mrb[1].mxu0 }
 0x163   : > { %v1919_v55 = vadd.f32 %v431_v54, %v1915_v51  ;;  %v433_v56 = vpop.f32.mrb[2].mxu0 }
 0x164   : > { %v1921_v57 = vmul.f32 0.70710677, %v430_v53  ;;  %v434_v58 = vadd.f32 %v433_v56, %v1913_v50  ;;  %v435_v59 = vpop.f32.mrb[3].mxu0  ;;  %v1939_v16 = vmul.f32 0.5, %v430_v53 }
 0x165   : > { %2369 = vst [vmem:[#allocation12_spill] sm:$0xff] %v1919_v55  ;;  %v1925_v60 = vmul.f32 0.70710677, %v1919_v55  ;;  %v1928_v61 = vadd.f32 %v435_v59, %v1915_v51 }
 0x166   : > { %v500_v62 = vand.u32 2147483647, %v1921_v57  ;;  %v1931_v63 = vmul.f32 0.70710677, %v434_v58  ;;  %v1954_v32 = vmul.f32 0.5, %v434_v58 }
 0x167   : > { %2370 = vst [vmem:[#allocation13_spill] sm:$0xff] %v1928_v61  ;;  %v501_v0 = vand.u32 2147483647, %v1925_v60  ;;  %v1936_v4 = vmul.f32 0.70710677, %v1928_v61 }
 0x168   : > { %v516_v1 = vmul.f32 0.3275911, %v500_v62  ;;  %v708_v2 = vsub.f32 0.0, %v500_v62  ;;  %v502_v3 = vand.u32 2147483647, %v1931_v63 }
 0x169   : > { %2371 = vst [vmem:[#allocation14_spill] sm:$0xff] %v1936_v4  ;;  %v709_v6 = vsub.f32 0.0, %v501_v0  ;;  %v439_v8 = vpop.f32.mrb[4].mxu0  ;;  %v517_v9 = vmul.f32 0.3275911, %v501_v0 }
 0x16a   : > { %v532_v5 = vadd.f32 1.0, %v516_v1  ;;  %v518_v7 = vmul.f32 0.3275911, %v502_v3  ;;  %v441_v10 = vpop.f32.mrb[5].mxu0  ;;  %v724_v11 = vmul.f32 %v708_v2, %v500_v62  ;;  %v503_v14 = vand.u32 2147483647, %v1936_v4 }
 0x16b   : > { %v443_v13 = vpop.f32.mrb[6].mxu0  ;;  %v725_v17 = vmul.f32 %v709_v6, %v501_v0  ;;  %v440_v18 = vadd.f32 %v439_v8, %v1913_v50  ;;  %v442_v19 = vadd.f32 %v441_v10, %v1915_v51  ;;  %v533_v21 = vadd.f32 1.0, %v517_v9 }
 0x16c   : > { %1445 = vrcp.f32 %v532_v5  ;;  %v534_v12 = vadd.f32 1.0, %v518_v7  ;;  %v445_v15 = vpop.f32.mrb[7].mxu0  ;;  %v710_v22 = vsub.f32 0.0, %v502_v3  ;;  %v444_v23 = vadd.f32 %v443_v13, %v1913_v50 }
 0x16d   : > { %v740_v24 = vmul.f32 1.442695, %v724_v11  ;;  %v1945_v25 = vmul.f32 0.70710677, %v440_v18  ;;  %v1948_v26 = vadd.f32 %v445_v15, %v1915_v51  ;;  %v711_v27 = vsub.f32 0.0, %v503_v14 }
 0x16e   : > { %1447 = vrcp.f32 %v534_v12  ;;  %v1950_v28 = vmul.f32 0.70710677, %v442_v19  ;;  %v1952_v29 = vmul.f32 0.70710677, %v444_v23  ;;  %v742_v31 = vmul.f32 1.442695, %v725_v17 }
 0x16f   : > { %v504_v33 = vand.u32 2147483647, %v1945_v25  ;;  %v726_v36 = vmul.f32 %v710_v22, %v502_v3  ;;  %v519_v40 = vmul.f32 0.3275911, %v503_v14  ;;  %v1967_v42 = vmul.f32 0.70710677, %v1948_v26 }
 0x170   : > { %v1959_v37 = vand.u32 2147483647, %v1950_v28  ;;  %v1962_v38 = vand.u32 2147483647, %v1952_v29  ;;  %1449 = vrcp.f32 %v533_v21  ;;  %v727_v43 = vmul.f32 %v711_v27, %v503_v14 }
 0x171   : > { %v449_v30 = vpop.f32.mrb[8].mxu0  ;;  %v520_v41 = vmul.f32 0.3275911, %v504_v33  ;;  %1451 = vpow2.f32 %v740_v24  ;;  %v1975_v49 = vand.u32 2147483647, %v1967_v42  ;;  %v535_v1 = vadd.f32 1.0, %v519_v40 }
 0x172   : > { %v451_v34 = vpop.f32.mrb[9].mxu0  ;;  %v521_v44 = vmul.f32 0.3275911, %v1959_v37  ;;  %v522_v45 = vmul.f32 0.3275911, %v1962_v38  ;;  %1453 = vpow2.f32 %v742_v31  ;;  %v1986_v6 = vmul.f32 0.5, %v440_v18 }
 0x173   : > { %v1964_v39 = vpop.f32.mrb[10].mxu0  ;;  %v536_v48 = vadd.f32 1.0, %v520_v41  ;;  %v744_v54 = vmul.f32 1.442695, %v726_v36  ;;  %v523_v62 = vmul.f32 0.3275911, %v1975_v49  ;;  %v450_v9 = vadd.f32 %v449_v30, %v1913_v50 }
 0x174   : > { %v1977_v52 = vpop.f32.mrb[11].mxu0  ;;  %v537_v56 = vadd.f32 1.0, %v521_v44  ;;  %v538_v59 = vadd.f32 1.0, %v522_v45  ;;  %v746_v2 = vmul.f32 1.442695, %v727_v43  ;;  %v712_v7 = vsub.f32 0.0, %v504_v33 }
 0x175   : > { %1455 = vrcp.f32 %v536_v48  ;;  %v539_v8 = vadd.f32 1.0, %v523_v62  ;;  %v1993_v13 = vmul.f32 0.5, %v442_v19  ;;  %v1997_v15 = vmul.f32 0.5, %v444_v23 }
 0x176   : > { %v1971_v46 = vpop.eup %1445  ;;  %1457 = vrcp.f32 %v537_v56  ;;  %v1999_v17 = vmul.f32 0.70710677, %v450_v9  ;;  %v2002_v18 = vadd.f32 %v451_v34, %v1915_v51  ;;  %v713_v27 = vsub.f32 0.0, %v1959_v37 }
 0x177   : > { %v564_v53 = vmul.f32 1.0614054, %v1971_v46  ;;  %1459 = vpow2.f32 %v744_v54  ;;  %v728_v30 = vmul.f32 %v712_v7, %v504_v33  ;;  %v714_v19 = vsub.f32 0.0, %v1962_v38 }
 0x178   : > { %v1984_v5 = vpop.eup %1447  ;;  %1461 = vrcp.f32 %v538_v59  ;;  %v2009_v23 = vand.u32 2147483647, %v1999_v17  ;;  %v2017_v41 = vmul.f32 0.70710677, %v2002_v18  ;;  %v2023_v44 = vmul.f32 0.5, %v1948_v26 }
 0x179   : > { %v580_v0 = vadd.f32 -1.4531521, %v564_v53  ;;  %v1982_v3 = vpop.f32.mrb[12].mxu0  ;;  %v566_v12 = vmul.f32 1.0614054, %v1984_v5  ;;  %1463 = vrcp.f32 %v535_v1  ;;  %v715_v45 = vsub.f32 0.0, %v1975_v49 }
 0x17a   : > { %v1989_v10 = vpop.f32.mrb[13].mxu0  ;;  %1465 = vrcp.f32 %v539_v8  ;;  %v2011_v31 = vpop.eup %1449  ;;  %v524_v48 = vmul.f32 0.3275911, %v2009_v23  ;;  %v729_v56 = vmul.f32 %v713_v27, %v1959_v37  ;;  %v2032_v62 = vand.u32 2147483647, %v2017_v41 }
 0x17b   : > { %v596_v11 = vmul.f32 %v1971_v46, %v580_v0  ;;  %v1995_v14 = vpop.f32.mrb[14].mxu0  ;;  %v582_v24 = vadd.f32 -1.4531521, %v566_v12  ;;  %v2019_v43 = vpop.eup %1451  ;;  %v748_v1 = vmul.f32 1.442695, %v728_v30  ;;  %v730_v26 = vmul.f32 %v714_v19, %v1962_v38 }
 0x17c   : > { %v2004_v21 = vpop.f32.mrb[15].mxu0  ;;  %v2027_v53 = vpop.eup %1453  ;;  %v540_v8 = vadd.f32 1.0, %v524_v48  ;;  %v2047_v38 = vadd.f32 %v1964_v39, %v1913_v50  ;;  %v750_v48 = vmul.f32 1.442695, %v729_v56 }
 0x17d   : > { %v612_v22 = vadd.f32 1.4214138, %v596_v11  ;;  %v598_v34 = vmul.f32 %v1984_v5, %v582_v24  ;;  %v525_v24 = vmul.f32 0.3275911, %v2032_v62  ;;  %v752_v35 = vmul.f32 1.442695, %v730_v26 }
 0x17e   : > { %1467 = vrcp.f32 %v540_v8  ;;  %v2058_v8 = vmul.f32 0.5, %v450_v9 }
 0x17f   : > { %v628_v36 = vmul.f32 %v1971_v46, %v612_v22  ;;  %v614_v54 = vadd.f32 1.4214138, %v598_v34  ;;  %v2034_v0 = vpop.eup %1455  ;;  %v731_v34 = vmul.f32 %v715_v45, %v1975_v49  ;;  %1469 = vpow2.f32 %v746_v2 }
 0x180   : > { %v2038_v11 = vpop.eup %1457  ;;  %v568_v37 = vmul.f32 1.0614054, %v2034_v0  ;;  %1471 = vpow2.f32 %v748_v1  ;;  %v541_v7 = vadd.f32 1.0, %v525_v24  ;;  %v2064_v1 = vmul.f32 0.70710677, %v2047_v38 }
 0x181   : > { %v644_v12 = vadd.f32 -0.28449672, %v628_v36  ;;  %v630_v22 = vmul.f32 %v1984_v5, %v614_v54  ;;  %v569_v27 = vmul.f32 1.0614054, %v2038_v11  ;;  %v2049_v30 = vpop.eup %1459  ;;  %v754_v56 = vmul.f32 1.442695, %v731_v34 }
 0x182   : > { %v584_v36 = vadd.f32 -1.4531521, %v568_v37  ;;  %v2051_v54 = vpop.eup %1461  ;;  %1473 = vrcp.f32 %v541_v7 }
 0x183   : > { %v646_v19 = vadd.f32 -0.28449672, %v630_v22  ;;  %v585_v58 = vadd.f32 -1.4531521, %v569_v27  ;;  %v2053_v59 = vpop.eup %1463  ;;  %v660_v49 = vmul.f32 %v1971_v46, %v644_v12  ;;  %v570_v39 = vmul.f32 1.0614054, %v2051_v54 }
 0x184   : > { %v600_v45 = vmul.f32 %v2034_v0, %v584_v36  ;;  %v2060_v22 = vpop.eup %1465  ;;  %v716_v12 = vsub.f32 0.0, %v2009_v23  ;;  %1475 = vpow2.f32 %v750_v48  ;;  %v2070_v36 = vand.u32 2147483647, %v2064_v1 }
 0x185   : > { %v601_v2 = vmul.f32 %v2038_v11, %v585_v58  ;;  %v662_v26 = vmul.f32 %v1984_v5, %v646_v19  ;;  %v586_v24 = vadd.f32 -1.4531521, %v570_v39  ;;  %v571_v9 = vmul.f32 1.0614054, %v2060_v22 }
 0x186   : > { %v616_v37 = vadd.f32 1.4214138, %v600_v45  ;;  %v676_v33 = vadd.f32 0.2548296, %v660_v49  ;;  %v2077_v39 = vmul.f32 0.5, %v2002_v18  ;;  %1477 = vpow2.f32 %v752_v35 }
 0x187   : > { %v617_v27 = vadd.f32 1.4214138, %v601_v2  ;;  %v602_v7 = vmul.f32 %v2051_v54, %v586_v24  ;;  %v587_v45 = vadd.f32 -1.4531521, %v571_v9  ;;  %v526_v48 = vmul.f32 0.3275911, %v2070_v36 }
 0x188   : > { %v632_v58 = vmul.f32 %v2034_v0, %v616_v37  ;;  %v678_v2 = vadd.f32 0.2548296, %v662_v26  ;;  %v2080_v20 = vpop.eup %1467  ;;  %v732_v24 = vmul.f32 %v716_v12, %v2009_v23  ;;  %v717_v26 = vsub.f32 0.0, %v2032_v62 }
 0x189   : > { %v633_v19 = vmul.f32 %v2038_v11, %v617_v27  ;;  %v618_v47 = vadd.f32 1.4214138, %v602_v7  ;;  %v603_v37 = vmul.f32 %v2060_v22, %v587_v45  ;;  %v542_v34 = vadd.f32 1.0, %v526_v48  ;;  %v2084_v61 = vpop.eup %1469 }
 0x18a   : > { %v648_v40 = vadd.f32 -0.28449672, %v632_v58  ;;  %v692_v27 = vmul.f32 %v1971_v46, %v676_v33  ;;  %v1472_v58 = vpop.eup %1471  ;;  %v694_v23 = vmul.f32 %v1984_v5, %v678_v2  ;;  %v2095_v46 = vadd.f32 %v1977_v52, %v1915_v51 }
 0x18b   : > { %v649_v49 = vadd.f32 -0.28449672, %v633_v19  ;;  %v634_v9 = vmul.f32 %v2051_v54, %v618_v47  ;;  %v619_v7 = vadd.f32 1.4214138, %v603_v37  ;;  %v572_v19 = vmul.f32 1.0614054, %v2080_v20 }
 0x18c   : > { %v664_v18 = vmul.f32 %v2034_v0, %v648_v40  ;;  %1479 = vrcp.f32 %v542_v34  ;;  %v2097_v40 = vpop.eup %1473  ;;  %v756_v48 = vmul.f32 1.442695, %v732_v24  ;;  %v733_v52 = vmul.f32 %v717_v26, %v2032_v62 }
 0x18d   : > { %v665_v35 = vmul.f32 %v2038_v11, %v649_v49  ;;  %v650_v12 = vadd.f32 -0.28449672, %v634_v9  ;;  %1481 = vpow2.f32 %v754_v56  ;;  %v635_v33 = vmul.f32 %v2060_v22, %v619_v7 }
 0x18e   : > { %v680_v47 = vadd.f32 0.2548296, %v664_v18  ;;  %v588_v45 = vadd.f32 -1.4531521, %v572_v19  ;;  %v772_v49 = vmul.f32 %v2019_v43, %v692_v27  ;;  %v573_v5 = vmul.f32 1.0614054, %v2097_v40  ;;  %v1476_v2 = vpop.eup %1475 }
 0x18f   : > { %v681_v37 = vadd.f32 0.2548296, %v665_v35  ;;  %v666_v34 = vmul.f32 %v2051_v54, %v650_v12  ;;  %v651_v56 = vadd.f32 -0.28449672, %v635_v33  ;;  %v2107_v18 = vadd.f32 %v1982_v3, %v1913_v50 }
 0x190   : > { %v604_v9 = vmul.f32 %v2080_v20, %v588_v45  ;;  %v774_v7 = vmul.f32 %v2049_v30, %v694_v23  ;;  %v589_v19 = vadd.f32 -1.4531521, %v573_v5  ;;  %v718_v43 = vsub.f32 0.0, %v2070_v36  ;;  %v1478_v45 = vpop.eup %1477 }
 0x191   : > { %v682_v24 = vadd.f32 0.2548296, %v666_v34  ;;  %v696_v27 = vmul.f32 %v2034_v0, %v680_v47  ;;  %v667_v35 = vmul.f32 %v2060_v22, %v651_v56  ;;  %v788_v55 = vsub.f32 1.0, %v772_v49 }
 0x192   : > { %v620_v12 = vadd.f32 1.4214138, %v604_v9  ;;  %v697_v62 = vmul.f32 %v2038_v11, %v681_v37  ;;  %1483 = vpow2.f32 %v756_v48  ;;  %v605_v3 = vmul.f32 %v2097_v40, %v589_v19 }
 0x193   : > { %v698_v30 = vmul.f32 %v2051_v54, %v682_v24  ;;  %v683_v26 = vadd.f32 0.2548296, %v667_v35  ;;  %v2119_v34 = vmul.f32 0.70710677, %v2095_v46  ;;  %v790_v0 = vsub.f32 1.0, %v774_v7 }
 0x194   : > { %v636_v23 = vmul.f32 %v2080_v20, %v620_v12  ;;  %v621_v47 = vadd.f32 1.4214138, %v605_v3  ;;  %v758_v5 = vmul.f32 1.442695, %v733_v52  ;;  %v734_v56 = vmul.f32 %v718_v43, %v2070_v36 }
 0x195   : > { %v776_v49 = vmul.f32 %v1472_v58, %v696_v27  ;;  %v699_v11 = vmul.f32 %v2060_v22, %v683_v26  ;;  %v511_v37 = vand.u32 2147483647, %v2119_v34  ;;  %v2372_v24 = vand.u32 2147483648, %v1921_v57 }
 0x196   : > { %v2122_v9 = vpop.eup %1479  ;;  %v652_v48 = vadd.f32 -0.28449672, %v636_v23  ;;  %v777_v35 = vmul.f32 %v1476_v2, %v697_v62  ;;  %v637_v12 = vmul.f32 %v2097_v40, %v621_v47  ;;  %v778_v52 = vmul.f32 %v1478_v45, %v698_v30 }
 0x197   : > { %v1482_v54 = vpop.eup %1481  ;;  %v852_v19 = vor.u32 %v2372_v24, %v788_v55  ;;  %v574_v7 = vmul.f32 1.0614054, %v2122_v9  ;;  %v527_v43 = vmul.f32 0.3275911, %v511_v37  ;;  %v2373_v58 = vand.u32 2147483648, %v1931_v63 }
 0x198   : > { %v779_v3 = vmul.f32 %v1482_v54, %v699_v11  ;;  %v668_v36 = vmul.f32 %v2080_v20, %v652_v48  ;;  %v653_v27 = vadd.f32 -0.28449672, %v637_v12  ;;  %v760_v23 = vmul.f32 1.442695, %v734_v56 }
 0x199   : > { %v854_v22 = vor.u32 %v2373_v58, %v790_v0  ;;  %v590_v26 = vadd.f32 -1.4531521, %v574_v7  ;;  %v792_v33 = vsub.f32 1.0, %v776_v49  ;;  %v543_v57 = vadd.f32 1.0, %v527_v43 }
 0x19a   : > { %v684_v4 = vadd.f32 0.2548296, %v668_v36  ;;  %v2135_v55 = vadd.f32 %v1989_v10, %v1915_v51  ;;  %v793_v2 = vsub.f32 1.0, %v777_v35  ;;  %v669_v45 = vmul.f32 %v2097_v40, %v653_v27 }
 0x19b   : > { %1485 = vpow2.f32 %v758_v5  ;;  %v606_v62 = vmul.f32 %v2122_v9, %v590_v26  ;;  %v884_v30 = vadd.f32 1.0, %v852_v19  ;;  %v794_v47 = vsub.f32 1.0, %v778_v52 }
 0x19c   : > { %v795_v63 = vsub.f32 1.0, %v779_v3  ;;  %1487 = vrcp.f32 %v543_v57  ;;  %v1484_v0 = vpop.eup %1483  ;;  %v886_v11 = vadd.f32 1.0, %v854_v22  ;;  %v700_v56 = vmul.f32 %v2080_v20, %v684_v4 }
 0x19d   : > { %v622_v49 = vadd.f32 1.4214138, %v606_v62  ;;  %1489 = vpow2.f32 %v760_v23  ;;  %v2374_v48 = vand.u32 2147483648, %v1945_v25  ;;  %v685_v54 = vadd.f32 0.2548296, %v669_v45 }
 0x19e   : > { %v719_v24 = vsub.f32 0.0, %v511_v37  ;;  %v2143_v35 = vmul.f32 0.70710677, %v2107_v18  ;;  %v2375_v5 = vand.u32 2147483648, %v1950_v28  ;;  %v2148_v12 = vmul.f32 0.5, %v2047_v38 }
 0x19f   : > { %v856_v10 = vor.u32 %v2374_v48, %v792_v33  ;;  %v638_v7 = vmul.f32 %v2122_v9, %v622_v49  ;;  %v2152_v4 = vmul.f32 0.70710677, %v2135_v55  ;;  %v2155_v20 = vmul.f32 %v884_v30, %v1939_v16 }
 0x1a0   : > { %v857_v19 = vor.u32 %v2375_v5, %v793_v2  ;;  %v2376_v25 = vand.u32 2147483648, %v1952_v29  ;;  %v2377_v52 = vand.u32 2147483648, %v1967_v42  ;;  %v512_v28 = vand.u32 2147483647, %v2143_v35 }
 0x1a1   : > { %v2163_v36 = vmul.f32 %v886_v11, %v1954_v32  ;;  %v780_v38 = vmul.f32 %v1484_v0, %v700_v56  ;;  %v654_v43 = vadd.f32 -0.28449672, %v638_v7  ;;  %v513_v58 = vand.u32 2147483647, %v2152_v4 }
 0x1a2   : > { %v858_v33 = vor.u32 %v2376_v25, %v794_v47  ;;  %v859_v3 = vor.u32 %v2377_v52, %v795_v63  ;;  %v888_v22 = vadd.f32 1.0, %v856_v10  ;;  %v701_v27 = vmul.f32 %v2097_v40, %v685_v54 }
 0x1a3   : > { %v735_v16 = vmul.f32 %v719_v24, %v511_v37  ;;  %v528_v26 = vmul.f32 0.3275911, %v512_v28  ;;  %v889_v23 = vadd.f32 1.0, %v857_v19  ;;  %v670_v29 = vmul.f32 %v2122_v9, %v654_v43 }
 0x1a4   : > { %v830_v42 = vand.u32 2147483648, %v2064_v1  ;;  %v529_v57 = vmul.f32 0.3275911, %v513_v58  ;;  %v890_v2 = vadd.f32 1.0, %v858_v33  ;;  %v891_v45 = vadd.f32 1.0, %v859_v3 }
 0x1a5   : > { %v544_v62 = vadd.f32 1.0, %v528_v26  ;;  %v2171_v32 = vadd.f32 %v1995_v14, %v1913_v50  ;;  %v1486_v30 = vpop.eup %1485  ;;  %v796_v47 = vsub.f32 1.0, %v780_v38  ;;  %v686_v63 = vadd.f32 0.2548296, %v670_v29 }
 0x1a6   : > { %v2174_v40 = vmul.f32 0.5, %v2095_v46  ;;  %v545_v37 = vadd.f32 1.0, %v529_v57  ;;  %v2176_v0 = vpop.eup %1487  ;;  %v2179_v11 = vmul.f32 %v888_v22, %v1986_v6  ;;  %v781_v1 = vmul.f32 %v1486_v30, %v701_v27 }
 0x1a7   : > { %v762_v56 = vmul.f32 1.442695, %v735_v16  ;;  %1491 = vrcp.f32 %v544_v62  ;;  %v1490_v49 = vpop.eup %1489  ;;  %v2182_v48 = vmul.f32 %v889_v23, %v1993_v13  ;;  %v702_v50 = vmul.f32 %v2122_v9, %v686_v63 }
 0x1a8   : > { %v575_v14 = vmul.f32 1.0614054, %v2176_v0  ;;  %1493 = vrcp.f32 %v545_v37  ;;  %v2187_v46 = vmul.f32 %v890_v2, %v1997_v15  ;;  %v2190_v10 = vmul.f32 %v891_v45, %v2023_v44 }
 0x1a9   : > { %v2193_v6 = vmul.f32 0.70710677, %v2171_v32  ;;  %v2197_v54 = vadd.f32 %v2004_v21, %v1915_v51  ;;  %v2378_v13 = vand.u32 2147483648, %v1999_v17  ;;  %v782_v9 = vmul.f32 %v1490_v49, %v702_v50 }
 0x1aa   : > { %v591_v5 = vadd.f32 -1.4531521, %v575_v14  ;;  %v565_v19 = vmul.f32 1.0614054, %v2011_v31  ;;  %v797_v7 = vsub.f32 1.0, %v781_v1  ;;  %1495 = vpow2.f32 %v762_v56 }
 0x1ab   : > { %v860_v24 = vor.u32 %v2378_v13, %v796_v47  ;;  %v720_v15 = vsub.f32 0.0, %v512_v28  ;;  %v514_v44 = vand.u32 2147483647, %v2193_v6  ;;  %v798_v25 = vsub.f32 1.0, %v782_v9 }
 0x1ac   : > { %v607_v33 = vmul.f32 %v2176_v0, %v591_v5  ;;  %v2205_v52 = vmul.f32 0.70710677, %v2197_v54  ;;  %v567_v51 = vmul.f32 1.0614054, %v2053_v59  ;;  %v721_v21 = vsub.f32 0.0, %v513_v58 }
 0x1ad   : > { %v530_v17 = vmul.f32 0.3275911, %v514_v44  ;;  %v581_v3 = vadd.f32 -1.4531521, %v565_v19  ;;  %v916_v38 = vpack.c.bf16 %v2163_v36, %v2155_v20  ;;  %v892_v43 = vadd.f32 1.0, %v860_v24 }
 0x1ae   : > { %v862_v22 = vor.u32 %v830_v42, %v798_v25  ;;  %v623_v27 = vadd.f32 1.4214138, %v607_v33  ;;  %v515_v16 = vand.u32 2147483647, %v2205_v52  ;;  %v736_v26 = vmul.f32 %v720_v15, %v512_v28 }
 0x1af   : > { %v546_v23 = vadd.f32 1.0, %v530_v17  ;;  %v583_v29 = vadd.f32 -1.4531521, %v567_v51  ;;  %v597_v57 = vmul.f32 %v2011_v31, %v581_v3  ;;  %v2379_v2 = vand.u32 2147483648, %v2017_v41 }
 0x1b0   : > { %v894_v62 = vadd.f32 1.0, %v862_v22  ;;  %v639_v30 = vmul.f32 %v2176_v0, %v623_v27  ;;  %v531_v47 = vmul.f32 0.3275911, %v515_v16  ;;  %v737_v37 = vmul.f32 %v721_v21, %v513_v58 }
 0x1b1   : > { %v861_v45 = vor.u32 %v2379_v2, %v797_v7  ;;  %v2215_v63 = vpop.eup %1491  ;;  %1497 = vrcp.f32 %v546_v23  ;;  %v599_v42 = vmul.f32 %v2053_v59, %v583_v29  ;;  %v613_v1 = vadd.f32 1.4214138, %v597_v57 }
 0x1b2   : > { %v2218_v56 = vpop.eup %1493  ;;  %v2221_v28 = vmul.f32 %v892_v43, %v2058_v8  ;;  %v655_v49 = vadd.f32 -0.28449672, %v639_v30  ;;  %v576_v41 = vmul.f32 1.0614054, %v2215_v63  ;;  %v547_v50 = vadd.f32 1.0, %v531_v47 }
 0x1b3   : > { %v2225_v14 = vmul.f32 %v894_v62, %v2148_v12  ;;  %v764_v13 = vmul.f32 1.442695, %v736_v26  ;;  %v577_v24 = vmul.f32 1.0614054, %v2218_v56  ;;  %v615_v58 = vadd.f32 1.4214138, %v599_v42 }
 0x1b4   : > { %v671_v9 = vmul.f32 %v2176_v0, %v655_v49  ;;  %v592_v5 = vadd.f32 -1.4531521, %v576_v41  ;;  %1499 = vrcp.f32 %v547_v50  ;;  %v629_v19 = vmul.f32 %v2011_v31, %v613_v1  ;;  %v1496_v7 = vpop.eup %1495 }
 0x1b5   : > { %v593_v8 = vadd.f32 -1.4531521, %v577_v24  ;;  %v722_v15 = vsub.f32 0.0, %v514_v44  ;;  %v631_v25 = vmul.f32 %v2053_v59, %v615_v58  ;;  %v919_v33 = vpack.c.bf16 %v2190_v10, %v2182_v48 }
 0x1b6   : > { %v687_v12 = vadd.f32 0.2548296, %v671_v9  ;;  %v608_v51 = vmul.f32 %v2215_v63, %v592_v5  ;;  %v645_v21 = vadd.f32 -0.28449672, %v629_v19  ;;  %v918_v17 = vpack.c.bf16 %v2187_v46, %v2179_v11  ;;  %v1267_v46 = vld [vmem:[%s2351_s4] ss:$0 sm:$0xff] }
 0x1b7   : > { %v609_v3 = vmul.f32 %v2218_v56, %v593_v8  ;;  %v723_v43 = vsub.f32 0.0, %v515_v16  ;;  %v647_v22 = vadd.f32 -0.28449672, %v631_v25  ;;  %v920_v27 = vpack.c.bf16 %v2225_v14, %v2221_v28 }
 0x1b8   : > { %v703_v26 = vmul.f32 %v2176_v0, %v687_v12  ;;  %v831_v23 = vand.u32 2147483648, %v2119_v34  ;;  %v624_v29 = vadd.f32 1.4214138, %v608_v51  ;;  %v661_v57 = vmul.f32 %v2011_v31, %v645_v21 }
 0x1b9   : > { %v625_v2 = vadd.f32 1.4214138, %v609_v3  ;;  %v766_v62 = vmul.f32 1.442695, %v737_v37  ;;  %v738_v30 = vmul.f32 %v722_v15, %v514_v44  ;;  %v663_v47 = vmul.f32 %v2053_v59, %v647_v22 }
 0x1ba   : > { %v893_v42 = vadd.f32 1.0, %v861_v45  ;;  %v783_v1 = vmul.f32 %v1496_v7, %v703_v26  ;;  %v640_v49 = vmul.f32 %v2215_v63, %v624_v29  ;;  %v677_v41 = vadd.f32 0.2548296, %v661_v57 }
 0x1bb   : > { %v1498_v50 = vpop.eup %1497  ;;  %1501 = vpow2.f32 %v764_v13  ;;  %v641_v24 = vmul.f32 %v2218_v56, %v625_v2  ;;  %v739_v0 = vmul.f32 %v723_v43, %v515_v16  ;;  %v679_v58 = vadd.f32 0.2548296, %v663_v47 }
 0x1bc   : > { %v799_v34 = vsub.f32 1.0, %v783_v1  ;;  %v656_v9 = vadd.f32 -0.28449672, %v640_v49  ;;  %v578_v5 = vmul.f32 1.0614054, %v1498_v50  ;;  %v693_v19 = vmul.f32 %v2011_v31, %v677_v41  ;;  %v2383_v41 = vld [vmem:[#allocation12_spill] sm:$0xff] }
 0x1bd   : > { %v657_v37 = vadd.f32 -0.28449672, %v641_v24  ;;  %1503 = vpow2.f32 %v766_v62  ;;  %v768_v44 = vmul.f32 1.442695, %v738_v30  ;;  %v695_v45 = vmul.f32 %v2053_v59, %v679_v58 }
 0x1be   : > { %v1500_v7 = vpop.eup %1499  ;;  %v863_v8 = vor.u32 %v831_v23, %v799_v34  ;;  %v672_v15 = vmul.f32 %v2215_v63, %v656_v9  ;;  %v594_v25 = vadd.f32 -1.4531521, %v578_v5  ;;  %v773_v13 = vmul.f32 %v2027_v53, %v693_v19  ;;  %v2384_v34 = vld [vmem:[#allocation13_spill] sm:$0xff] }
 0x1bf   : > { %v673_v16 = vmul.f32 %v2218_v56, %v657_v37  ;;  %v579_v12 = vmul.f32 1.0614054, %v1500_v7  ;;  %v770_v51 = vmul.f32 1.442695, %v739_v0  ;;  %v775_v21 = vmul.f32 %v2084_v61, %v695_v45  ;;  %v2381_v61 = vld [vmem:[#allocation14_spill] sm:$0xff] }
 0x1c0   : > { %v895_v3 = vadd.f32 1.0, %v863_v8  ;;  %v688_v31 = vadd.f32 0.2548296, %v672_v15  ;;  %v610_v43 = vmul.f32 %v1498_v50, %v594_v25  ;;  %v789_v22 = vsub.f32 1.0, %v773_v13 }
 0x1c1   : > { %v909_v26 = vmul.f32 %v893_v42, %v2077_v39  ;;  %v689_v59 = vadd.f32 0.2548296, %v673_v16  ;;  %v595_v29 = vadd.f32 -1.4531521, %v579_v12  ;;  %v791_v23 = vsub.f32 1.0, %v775_v21 }
 0x1c2   : > { %v911_v57 = vmul.f32 %v895_v3, %v2174_v40  ;;  %v704_v2 = vmul.f32 %v2215_v63, %v688_v31  ;;  %v626_v53 = vadd.f32 1.4214138, %v610_v43  ;;  %v2380_v62 = vand.u32 2147483648, %v1925_v60 }
 0x1c3   : > { %1505 = vpow2.f32 %v768_v44  ;;  %v611_v47 = vmul.f32 %v1500_v7, %v595_v29  ;;  %v2382_v1 = vand.u32 2147483648, %v2381_v61  ;;  %v469_v24 = vmul.f32 0.5, %v2383_v41 }
 0x1c4   : > { %v853_v30 = vor.u32 %v2380_v62, %v789_v22  ;;  %v642_v0 = vmul.f32 %v1498_v50, %v626_v53  ;;  %v921_v42 = vpack.c.bf16 %v911_v57, %v909_v26  ;;  %v471_v9 = vmul.f32 0.5, %v2384_v34 }
 0x1c5   : > { %v855_v49 = vor.u32 %v2382_v1, %v791_v23  ;;  %v1502_v58 = vpop.eup %1501  ;;  %v705_v40 = vmul.f32 %v2218_v56, %v689_v59  ;;  %v627_v63 = vadd.f32 1.4214138, %v611_v47  ;;  %1507 = vpow2.f32 %v770_v51 }
 0x1c6   : > { %v885_v39 = vadd.f32 1.0, %v853_v30  ;;  %v784_v19 = vmul.f32 %v1502_v58, %v704_v2  ;;  %v658_v60 = vadd.f32 -0.28449672, %v642_v0  ;;  %v832_v31 = vand.u32 2147483648, %v2143_v35 }
 0x1c7   : > { %v887_v5 = vadd.f32 1.0, %v855_v49  ;;  %v1504_v37 = vpop.eup %1503  ;;  %v643_v44 = vmul.f32 %v1500_v7, %v627_v63  ;;  %v833_v29 = vand.u32 2147483648, %v2152_v4  ;;  %v834_v35 = vand.u32 2147483648, %v2193_v6 }
 0x1c8   : > { %v901_v45 = vmul.f32 %v885_v39, %v469_v24  ;;  %v674_v15 = vmul.f32 %v1498_v50, %v658_v60  ;;  %v785_v25 = vmul.f32 %v1504_v37, %v705_v40  ;;  %v800_v12 = vsub.f32 1.0, %v784_v19 }
 0x1c9   : > { %v903_v8 = vmul.f32 %v887_v5, %v471_v9  ;;  %v659_v13 = vadd.f32 -0.28449672, %v643_v44  ;;  %v835_v62 = vand.u32 2147483648, %v2205_v52  ;;  %v480_v30 = vmul.f32 0.5, %v2107_v18 }
 0x1ca   : > { %v690_v21 = vadd.f32 0.2548296, %v674_v15  ;;  %v801_v43 = vsub.f32 1.0, %v785_v25  ;;  %v864_v26 = vor.u32 %v832_v31, %v800_v12  ;;  %v482_v48 = vmul.f32 0.5, %v2171_v32 }
 0x1cb   : > { %v917_v16 = vpack.c.bf16 %v903_v8, %v901_v45  ;;  %v675_v3 = vmul.f32 %v1500_v7, %v659_v13  ;;  %v481_v47 = vmul.f32 0.5, %v2135_v55  ;;  %v483_v61 = vmul.f32 0.5, %v2197_v54 }
 0x1cc   : > { %v706_v56 = vmul.f32 %v1498_v50, %v690_v21  ;;  %v865_v50 = vor.u32 %v833_v29, %v801_v43  ;;  %v896_v20 = vadd.f32 1.0, %v864_v26 }
 0x1cd   : > { %1091 = vmatprep.mubr.bf16.mxu1 %v917_v16  ;;  %v1506_v51 = vpop.eup %1505  ;;  %v691_v22 = vadd.f32 0.2548296, %v675_v3 }
 0x1ce   : > { %1092 = vmatmul.mubr.bf16.vlgmr.msra.gmra.mrb[0].mxu1 %v916_v38  ;;  %v786_v59 = vmul.f32 %v1506_v51, %v706_v56  ;;  %v897_v4 = vadd.f32 1.0, %v865_v50  ;;  %v912_v6 = vmul.f32 %v896_v20, %v480_v30 }
 0x1cf   : > { %1099 = vmatprep.mubr.bf16.mxu1 %v919_v33  ;;  %v707_v23 = vmul.f32 %v1500_v7, %v691_v22  ;;  %v1508_v57 = vpop.eup %1507 }
 0x1d0   : > { %v802_v2 = vsub.f32 1.0, %v786_v59  ;;  %v913_v18 = vmul.f32 %v897_v4, %v481_v47 }
 0x1d1   : > { %v787_v53 = vmul.f32 %v1508_v57, %v707_v23 }
 0x1d2   : > { %v866_v36 = vor.u32 %v834_v35, %v802_v2 }
 0x1d3   : > { %v803_v38 = vsub.f32 1.0, %v787_v53 }
 0x1d4   : > { %v898_v10 = vadd.f32 1.0, %v866_v36 }
 0x1d5   : > { %v867_v33 = vor.u32 %v835_v62, %v803_v38 }
 0x1d6   : > { %1100 = vmatmul.mubr.bf16.gmra.mrb[4].mxu1 %v918_v17  ;;  %v914_v7 = vmul.f32 %v898_v10, %v482_v48 }
 0x1d7   : > { %1107 = vmatprep.mubr.bf16.mxu1 %v921_v42  ;;  %v899_v1 = vadd.f32 1.0, %v867_v33 }
 0x1d8   : > { %v922_v52 = vpack.c.bf16 %v914_v7, %v912_v6 }
 0x1d9   : > { %v915_v49 = vmul.f32 %v899_v1, %v483_v61 }
 0x1db   : > { %v923_v32 = vpack.c.bf16 %v915_v49, %v913_v18 }
 0x1de   : > { %1108 = vmatmul.mubr.bf16.gmra.mrb[8].mxu1 %v920_v27 }
 0x1df   : > { %1115 = vmatprep.mubr.bf16.mxu1 %v923_v32 }
 0x1e6   : > { %1116 = vmatmul.mubr.bf16.gmra.mrb[12].mxu1 %v922_v52 }
 0x2a1   : > { %v1307_v11 = vpop.f32.mrb[0].mxu1 }
 0x2a2   : > { %v1308_v55 = vpop.f32.mrb[1].mxu1 }
 0x2a3   : > { %v1309_v17 = vadd.f32 %v1308_v55, %v1307_v11  ;;  %v1310_v54 = vpop.f32.mrb[2].mxu1 }
 0x2a4   : > { %v1311_v41 = vpop.f32.mrb[3].mxu1 }
 0x2a5   : > { %v1094_v24 = vadd.f32 %v1309_v17, %v1267_v46  ;;  %v1312_v0 = vadd.f32 %v1311_v41, %v1310_v54 }
 0x2a7   : > { %1124 = vst [vmem:[%s2286_s28] sm:$0xff] %v1094_v24  ;;  %v1097_v28 = vadd.f32 %v1312_v0, %v1267_v46 }
 0x2a9   : > { %1125 = vst [vmem:[%s2286_s28 + $0x8] sm:$0xff] %v1097_v28  ;;  %v1313_v14 = vpop.f32.mrb[4].mxu1 }
 0x2aa   : > { %v1314_v27 = vpop.f32.mrb[5].mxu1 }
 0x2ab   : > { %v1315_v39 = vadd.f32 %v1314_v27, %v1313_v14  ;;  %v1316_v42 = vpop.f32.mrb[6].mxu1 }
 0x2ac   : > { %v1317_v58 = vpop.f32.mrb[7].mxu1 }
 0x2ad   : > { %v1102_v34 = vadd.f32 %v1315_v39, %v1267_v46  ;;  %v1318_v9 = vadd.f32 %v1317_v58, %v1316_v42 }
 0x2af   : > { %1126 = vst [vmem:[%s2286_s28 + $0x10] sm:$0xff] %v1102_v34  ;;  %v1105_v40 = vadd.f32 %v1318_v9, %v1267_v46 }
 0x2b1   : > { %1127 = vst [vmem:[%s2286_s28 + $0x18] sm:$0xff] %v1105_v40  ;;  %v1319_v63 = vpop.f32.mrb[8].mxu1 }
 0x2b2   : > { %v1320_v5 = vpop.f32.mrb[9].mxu1 }
 0x2b3   : > { %v1321_v19 = vadd.f32 %v1320_v5, %v1319_v63  ;;  %v1322_v60 = vpop.f32.mrb[10].mxu1 }
 0x2b4   : > { %v1323_v37 = vpop.f32.mrb[11].mxu1 }
 0x2b5   : > { %v1110_v44 = vadd.f32 %v1321_v19, %v1267_v46  ;;  %v1324_v45 = vadd.f32 %v1323_v37, %v1322_v60 }
 0x2b7   : > { %1128 = vst [vmem:[%s2286_s28 + $0x20] sm:$0xff] %v1110_v44  ;;  %v1113_v8 = vadd.f32 %v1324_v45, %v1267_v46 }
 0x2b9   : > { %1129 = vst [vmem:[%s2286_s28 + $0x28] sm:$0xff] %v1113_v8  ;;  %v1325_v15 = vpop.f32.mrb[12].mxu1 }
 0x2ba   : > { %v1326_v25 = vpop.f32.mrb[13].mxu1 }
 0x2bb   : > { %v1327_v13 = vadd.f32 %v1326_v25, %v1325_v15  ;;  %v1328_v16 = vpop.f32.mrb[14].mxu1 }
 0x2bc   : > { %v1329_v12 = vpop.f32.mrb[15].mxu1 }
 0x2bd   : > { %v1118_v21 = vadd.f32 %v1327_v13, %v1267_v46  ;;  %v1330_v3 = vadd.f32 %v1329_v12, %v1328_v16 }
 0x2bf   : > { %1130 = vst [vmem:[%s2286_s28 + $0x30] sm:$0xff] %v1118_v21  ;;  %v1121_v31 = vadd.f32 %v1330_v3, %v1267_v46 }
 0x2c1   : > { %1131 = vst [vmem:[%s2286_s28 + $0x38] sm:$0xff] %v1121_v31 }
 0x2c2   : > { %1608 = shalt.err (!%p1605_p1)
}
 0x2c3   : > { %s1609_s14 = scalar_lea.hbm %s2301_s12, 1024  ;;  %s1613_s15 = scalar_lea.hbm %s2352_s5, 2048 }
 0x2c4   : > { %p1610_p13 = scmp.ne.s32.totalorder %s2301_s12, %s1609_s14  ;;  %p1614_p4 = scmp.lt.u32.totalorder %s2301_s12, %s2352_s5 }
 0x2c5   : > { %p1615_p7 = scmp.lt.u32.totalorder %s1613_s15, %s1609_s14  ;;  %p1617_p11 = scmp.lt.u32.totalorder %s1609_s14, %s2301_s12 }
 0x2c6   : > { %p1611_p6 = pnand %p1610_p13, %p2385_p0 }
 0x2c7   : > { %p1616_p8 = por %p1615_p7, %p1614_p4 }
 0x2c8   : > { %p1612_p10 = pneg %p1611_p6 }
 0x2c9   : > { %p1618_p2 = por %p1617_p11, %p1616_p8 }
 0x2cb   : > { %p1619_p3 = pnand %p1618_p2, %p1612_p10 }
 0x2cd   : > { %1622 = shalt.err (!%p1619_p3)
}
 0x2ce   : > { %s1676_s17 = smov 128   ;;  %s1677_s11 = smov 8  }
 0x2cf   : > { %1341 = dma.vmem_to_hbm [thread:$0]  (%p2385_p0), %s2296_s13, 1024, %s2301_s12, %s1133_s30, %s1676_s17, %s1676_s17, %s1677_s11  }
 0x2d0 PF: > { %s1161_s29 = sand.u32 1, %s1653_s18   ;;  %p2386_p5 = scmp.ne.s32.totalorder %s2360_s25, 0 }
 0x2d1   : > { %p2387_p9 = scmp.ge.s32.totalorder %s1665_s21, 2  ;;  %s1162_s9 = scalar_lea.sflag [#allocation4], %s1161_s29 }
 0x2d3   : > { %p1355_p12 = pnand %p2387_p9, %p2386_p5 }
 0x2d5   : > { %1648 = dma.done.wait (!%p1355_p12), %s1162_s9, 1024  }
 0x2d6   : > { %1650 = vsyncadd (!%p1355_p12), %s1162_s9, 4294966272  ;;  %p19_p1 = scmp.ge.s32.totalorder %s1821_s23, 4   ;;  %s2388_s18 = smov %s1657_s19 }
 0x2d7   : > { %s2389_s19 = smov %s1661_s20  ;;  %s2390_s20 = smov %s1830_s7 }
 0x2d8   : > { %s2391_s21 = smov %s1821_s23  ;;  %21 = sbr.rel (!%p19_p1) target bundleno = 6 (0x6), region = 93 }
 0x2df   :  { %1167 = vsyncpa [#allocation3], 1 }
 0x2e0   :  { %1169 = vsyncpa [#allocation3 + $0x1], 1 }
 0x2e1   :  { %1170 = vsyncpa [#allocation6], 1 }
 0x2e2   :  { %1171 = vsyncpa [#allocation4], 1 }
 0x2e3   :  { %1173 = vsyncpa [#allocation4 + $0x1], 1 }

</bundles_post_ra>
